<compile_context>
chip_gen: v7x
topology: tpu7x:2x2x1
jax: 0.10.0
libtpu: 0.0.40
codegen_flags: <defaults>
</compile_context>

<pallas_src>
import numpy as np
import jax
import jax.numpy as jnp
from jax.experimental import pallas as pl
from jax.experimental.pallas import tpu as pltpu


# ---------------------------------------------------------------------------
# Separable bilinear interpolation weight matrix (numpy -> compile-time constant).
# Matches torch.nn.functional.interpolate(mode="bilinear", align_corners=False,
# antialias=False) -- the path torchvision F.resize takes for tensors with
# InterpolationMode.BILINEAR and antialias=None.
# ---------------------------------------------------------------------------
def bilinear_weight_matrix(in_size: int, out_size: int) -> np.ndarray:
    scale = in_size / out_size
    dst = np.arange(out_size, dtype=np.float32)
    src = (dst + 0.5) * scale - 0.5
    src = np.maximum(src, 0.0)                       # PyTorch clamps negative src to 0
    i0 = np.minimum(np.floor(src).astype(np.int64), in_size - 1)
    i1 = np.minimum(i0 + 1, in_size - 1)
    lam = (src - i0).astype(np.float32)
    w = np.zeros((out_size, in_size), dtype=np.float32)
    rows = np.arange(out_size)
    np.add.at(w, (rows, i0), 1.0 - lam)
    np.add.at(w, (rows, i1), lam)
    return w                                          # (out_size, in_size)


def _divisors(n: int):
    return [d for d in range(1, n + 1) if n % d == 0]


def _pick_blocking(nc: int, size: int, h_in: int, w_in: int, *,
                   lane_target: int = 256, sublane_target: int = 256,
                   bd_weight_budget_bytes: int = 4 << 20, itemsize: int = 2):
    """Pick (B, Gb): B channels packed along lanes, Gb groups folded into sublanes.

    Caps: lane width B*max(W_in,size) <= lane_target (256 fills v6e/v7x MXU, is a
    multiple of v5e's 128); sublane height Gb*max(H_in,size) <= sublane_target;
    block-diagonal weight VMEM (B^2 resp. Gb^2 growth) <= budget -> bounds the
    FLOP inflation of the zero-padded matmuls.
    """
    b = 1
    for d in _divisors(nc):
        if d * max(w_in, size) <= lane_target and \
           d * d * w_in * size * itemsize <= bd_weight_budget_bytes:
            b = d
    rem = nc // b
    gb = 1
    for d in _divisors(rem):
        if d * max(h_in, size) <= sublane_target and \
           d * d * h_in * size * itemsize <= bd_weight_budget_bytes:
            gb = d
    return b, gb


# ---------------------------------------------------------------------------
# Pallas kernel: one (Gb-group x B-channel) slab per grid step, two MXU matmuls,
# lane-dense output store.
# ---------------------------------------------------------------------------
def resize_crop_kernel(whbd_ref, wwbd_ref, x_ref, o_ref):
    # whbd_ref : (Gb*size, Gb*H_in)    block-diag, cropped row-interp matrix (bf16)
    # wwbd_ref : (B*W_in,  B*size)     block-diag, pre-transposed col-interp matrix (bf16)
    # x_ref    : (1, Gb*H_in, B*W_in)  Gb groups (sublanes) x B channels (lanes)
    # o_ref    : (1, Gb*size, B*size)  lane-dense output slab
    tmp = jnp.dot(whbd_ref[...], x_ref[0],
                  preferred_element_type=jnp.float32)             # (Gb*size, B*W_in)
    out = jnp.dot(tmp.astype(wwbd_ref.dtype), wwbd_ref[...],
                  preferred_element_type=jnp.float32)             # (Gb*size, B*size)
    if jnp.issubdtype(o_ref.dtype, jnp.integer):
        info = jnp.iinfo(o_ref.dtype)
        out = jnp.clip(jnp.round(out), info.min, info.max)        # no silent wrap
    o_ref[0] = out.astype(o_ref.dtype)


# ---------------------------------------------------------------------------
# Wrapper reproducing ResizeCrop.forward for NCHW tensors.
# ---------------------------------------------------------------------------
def resize_crop(img: jnp.ndarray, size: int, extra_size: int, *,
                compute_dtype=jnp.bfloat16) -> jnp.ndarray:
    N, C, H_in, W_in = img.shape
    NC = N * C
    resize_h = resize_w = size + extra_size
    # Identical Python expression to the module's __init__, so rounding for odd
    # extra_size matches ResizeCrop.crop_top exactly.
    crop_top = int(round(extra_size / 2.0))
    crop_left = crop_top

    # Full resize weight matrices; fuse the crop by slicing rows (compile-time consts).
    wh = bilinear_weight_matrix(H_in, resize_h)[crop_top:crop_top + size]     # (size, H_in)
    ww = bilinear_weight_matrix(W_in, resize_w)[crop_left:crop_left + size]   # (size, W_in)

    c_itemsize = jnp.dtype(compute_dtype).itemsize
    out_itemsize = jnp.dtype(img.dtype).itemsize
    B, Gb = _pick_blocking(NC, size, H_in, W_in, itemsize=c_itemsize)
    G = NC // (B * Gb)
    # NOTE: on v7x (2 TensorCores) a grid of >= 2 is preferred so "parallel" can shard;
    # with only NC channel-slices available, lane/sublane density takes priority here.

    # Block-diagonal weights (numpy constants), cast to the MXU compute dtype.
    # WhBD[g*size+s, g'*H_in+h] = (g==g') * wh[s,h]
    whbd = np.einsum('gk,sh->gskh', np.eye(Gb, dtype=np.float32), wh
                     ).reshape(Gb * size, Gb * H_in)
    # WwBD[b*W_in+w, c*size+t] = (b==c) * ww[t,w]   (pre-transposed: no in-kernel .T)
    wwbd = np.einsum('bc,wt->bwct', np.eye(B, dtype=np.float32), ww.T
                     ).reshape(B * W_in, B * size)
    whbd = jnp.asarray(whbd, dtype=compute_dtype)
    wwbd = jnp.asarray(wwbd, dtype=compute_dtype)

    # Pack: sublanes = Gb groups x H_in, lanes = B channels x W_in; bf16 halves HBM traffic.
    # TODO(synk): for real targets with size >= 128, block-diagonalize the height matrix
    # instead and keep x contiguous as (NC*H_in, W_in) to avoid these wrapper transposes.
    x = (img.reshape(G, Gb, B, H_in, W_in)
            .transpose(0, 1, 3, 2, 4)
            .reshape(G, Gb * H_in, B * W_in)
            .astype(compute_dtype))

    # VMEM budgeting: weights single-buffered, x/out double-buffered, f32 intermediates.
    whbd_b = whbd.size * c_itemsize
    wwbd_b = wwbd.size * c_itemsize
    x_blk_b = Gb * H_in * B * W_in * c_itemsize
    out_blk_b = Gb * size * B * size * out_itemsize
    tmp_b = Gb * size * (B * W_in + B * size) * 4
    vmem_need = whbd_b + wwbd_b + 2 * (x_blk_b + out_blk_b) + tmp_b
    compiler_kwargs = dict(dimension_semantics=("parallel",))
    if vmem_need > (12 << 20):   # would be tight under v5e's small default scoped VMEM
        compiler_kwargs["vmem_limit_bytes"] = int(min(max(2 * vmem_need, 32 << 20), 48 << 20))

    flops = 2 * G * ((Gb * size) * (Gb * H_in) * (B * W_in)
                     + (Gb * size) * (B * W_in) * (B * size))
    bytes_accessed = (x.size * c_itemsize + whbd_b + wwbd_b
                      + G * Gb * size * B * size * out_itemsize)
    cost = pl.CostEstimate(flops=int(flops), transcendentals=0,
                           bytes_accessed=int(bytes_accessed))

    def _run(single_buffer_weights: bool):
        wkw = dict(pipeline_mode=pl.Buffered(1)) if single_buffer_weights else {}
        grid_spec = pltpu.PrefetchScalarGridSpec(
            num_scalar_prefetch=0,
            grid=(G,),
            in_specs=[
                pl.BlockSpec((Gb * size, Gb * H_in), lambda g: (0, 0), **wkw),   # WhBD (const)
                pl.BlockSpec((B * W_in, B * size), lambda g: (0, 0), **wkw),     # WwBD (const)
                pl.BlockSpec((1, Gb * H_in, B * W_in), lambda g: (g, 0, 0)),     # packed slab
            ],
            out_specs=pl.BlockSpec((1, Gb * size, B * size), lambda g: (g, 0, 0)),
        )
        return pl.pallas_call(
            resize_crop_kernel,
            out_shape=jax.ShapeDtypeStruct((G, Gb * size, B * size), img.dtype),
            grid_spec=grid_spec,
            compiler_params=pltpu.CompilerParams(**compiler_kwargs),
            cost_estimate=cost,
        )(whbd, wwbd, x)

    try:
        out = _run(True)
    except Exception:
        # Older JAX without BlockSpec(pipeline_mode=...): fall back to default buffering.
        out = _run(False)

    # Unpack sublane/lane packing back to (N, C, size, size) (layout plumbing only).
    out = (out.reshape(G, Gb, size, B, size)
              .transpose(0, 1, 3, 2, 4)
              .reshape(N, C, size, size))
    return out


# ---------------------------------------------------------------------------
# Pure-JAX f32 reference (direct gather formulation of torch bilinear, align_corners=False)
# ---------------------------------------------------------------------------
def _resize_crop_ref(img, size, extra_size):
    N, C, H, W = img.shape
    out_h = out_w = size + extra_size
    crop = int(round(extra_size / 2.0))

    def coords(in_size, out_size):
        scale = in_size / out_size
        src = (jnp.arange(out_size, dtype=jnp.float32) + 0.5) * scale - 0.5
        src = jnp.maximum(src, 0.0)
        i0 = jnp.minimum(jnp.floor(src).astype(jnp.int32), in_size - 1)
        i1 = jnp.minimum(i0 + 1, in_size - 1)
        lam = src - i0.astype(jnp.float32)
        return i0, i1, lam

    h0, h1, lh = coords(H, out_h)
    w0, w1, lw = coords(W, out_w)
    lh = lh.reshape(out_h, 1)
    xf = img.astype(jnp.float32)
    top = xf[:, :, h0][:, :, :, w0] * (1.0 - lw) + xf[:, :, h0][:, :, :, w1] * lw
    bot = xf[:, :, h1][:, :, :, w0] * (1.0 - lw) + xf[:, :, h1][:, :, :, w1] * lw
    full = top * (1.0 - lh) + bot * lh
    return full[:, :, crop:crop + size, crop:crop + size]


if __name__ == "__main__":
    # Module config: crop size 16, resize to (16+8, 16+8)=24, crop_top=4.
    size = 16
    extra_size = 8

    key = jax.random.PRNGKey(0)
    # NCHW input image batch: (N=2, C=4, H=16, W=16)
    img = jax.random.uniform(key, (2, 4, 16, 16), dtype=jnp.float32)

    out = resize_crop(img, size, extra_size)
    jax.block_until_ready(out)

    assert out.shape == (2, 4, size, size), out.shape
    assert out.dtype == img.dtype

    ref = _resize_crop_ref(img, size, extra_size)
    err = float(jnp.max(jnp.abs(out.astype(jnp.float32) - ref)))
    # bf16 MXU operands (per perf review) -> tolerance relaxed vs the f32 reference.
    assert err < 2e-2, err

    # TODO(synk): max_size handling and antialiased downscaling of F.resize are not
    # implemented (module is used with max_size=None, antialias=None).
    print("KERNEL_OK")
</pallas_src>

<mosaic_0001>
module attributes {stable_mosaic.version = 11 : i64} {
  func.func @resize_crop_kernel(%arg0: i32, %arg1: memref<16x16xbf16, #tpu.memory_space<vmem>>, %arg2: memref<128x128xbf16, #tpu.memory_space<vmem>>, %arg3: memref<1x16x128xbf16, #tpu.memory_space<vmem>>, %arg4: memref<1x16x128xf32, #tpu.memory_space<vmem>>) attributes {dimension_semantics = [#tpu.dimension_semantics<parallel>], iteration_bounds = array<i64: 1>, scalar_prefetch = 0 : i64, scratch_operands = 0 : i64, tpu.core_type = #tpu.core_type<tc>, window_params = [{pipeline_mode = #tpu.pipeline_mode<synchronous>, transform_indices = @transform_0, window_bounds = array<i64: 16, 16>}, {pipeline_mode = #tpu.pipeline_mode<synchronous>, transform_indices = @transform_1, window_bounds = array<i64: 128, 128>}, {transform_indices = @transform_2, window_bounds = array<i64: 1, 16, 128>}, {transform_indices = @transform_3, window_bounds = array<i64: 1, 16, 128>}]} {
    %c0 = arith.constant 0 : index
    %c0_0 = arith.constant 0 : index
    %0 = vector.load %arg1[%c0, %c0_0] : memref<16x16xbf16, #tpu.memory_space<vmem>>, vector<16x16xbf16>
    %c0_1 = arith.constant 0 : index
    %c0_2 = arith.constant 0 : index
    %c0_3 = arith.constant 0 : index
    %1 = vector.load %arg3[%c0_1, %c0_2, %c0_3] : memref<1x16x128xbf16, #tpu.memory_space<vmem>>, vector<1x16x128xbf16>
    %2 = vector.shape_cast %1 : vector<1x16x128xbf16> to vector<16x128xbf16>
    %cst = arith.constant dense<0.000000e+00> : vector<16x128xf32>
    %3 = tpu.matmul %0, %2, %cst {dimension_numbers = #tpu.dot_dimension_numbers<[1], [0], [0], [1], [0, 0, 1, 1], [], []>} : vector<16x16xbf16>, vector<16x128xbf16>, vector<16x128xf32> -> vector<16x128xf32>
    %4 = arith.truncf %3 : vector<16x128xf32> to vector<16x128xbf16>
    %c0_4 = arith.constant 0 : index
    %c0_5 = arith.constant 0 : index
    %5 = vector.load %arg2[%c0_4, %c0_5] : memref<128x128xbf16, #tpu.memory_space<vmem>>, vector<128x128xbf16>
    %cst_6 = arith.constant dense<0.000000e+00> : vector<16x128xf32>
    %6 = tpu.matmul %4, %5, %cst_6 {dimension_numbers = #tpu.dot_dimension_numbers<[1], [0], [0], [1], [0, 0, 1, 1], [], []>} : vector<16x128xbf16>, vector<128x128xbf16>, vector<16x128xf32> -> vector<16x128xf32>
    %c0_7 = arith.constant 0 : index
    %c0_8 = arith.constant 0 : index
    %c0_9 = arith.constant 0 : index
    %7 = vector.load %arg4[%c0_7, %c0_8, %c0_9] : memref<1x16x128xf32, #tpu.memory_space<vmem>>, vector<1x16x128xf32>
    %8 = vector.shape_cast %7 : vector<1x16x128xf32> to vector<16x128xf32>
    %9 = vector.shape_cast %6 : vector<16x128xf32> to vector<1x16x128xf32>
    tpu.vector_store %arg4[%c0_7, %c0_8, %c0_9], %9 {strides = array<i32>} : memref<1x16x128xf32, #tpu.memory_space<vmem>>, vector<1x16x128xf32>,
    return
  }
  func.func @transform_0(%arg0: i32) -> (i32, i32) {
    %c0_i32 = arith.constant 0 : i32
    %c0_i32_0 = arith.constant 0 : i32
    %c0_i32_1 = arith.constant 0 : i32
    return %c0_i32, %c0_i32_0 : i32, i32
  }
  func.func @transform_1(%arg0: i32) -> (i32, i32) {
    %c0_i32 = arith.constant 0 : i32
    %c0_i32_0 = arith.constant 0 : i32
    %c0_i32_1 = arith.constant 0 : i32
    return %c0_i32, %c0_i32_0 : i32, i32
  }
  func.func @transform_2(%arg0: i32) -> (i32, i32, i32) {
    %c0_i32 = arith.constant 0 : i32
    %c0_i32_0 = arith.constant 0 : i32
    %c0_i32_1 = arith.constant 0 : i32
    return %arg0, %c0_i32, %c0_i32_0 : i32, i32, i32
  }
  func.func @transform_3(%arg0: i32) -> (i32, i32, i32) {
    %c0_i32 = arith.constant 0 : i32
    %c0_i32_0 = arith.constant 0 : i32
    %c0_i32_1 = arith.constant 0 : i32
    return %arg0, %c0_i32, %c0_i32_0 : i32, i32, i32
  }
}

module attributes {stable_mosaic.version = 11 : i64} {
  func.func @resize_crop_kernel(%arg0: i32, %arg1: memref<16x16xbf16, #tpu.memory_space<vmem>>, %arg2: memref<128x128xbf16, #tpu.memory_space<vmem>>, %arg3: memref<1x16x128xbf16, #tpu.memory_space<vmem>>, %arg4: memref<1x16x128xf32, #tpu.memory_space<vmem>>) attributes {dimension_semantics = [#tpu.dimension_semantics<parallel>], iteration_bounds = array<i64: 1>, scalar_prefetch = 0 : i64, scratch_operands = 0 : i64, tpu.core_type = #tpu.core_type<tc>, window_params = [{pipeline_mode = #tpu.pipeline_mode<synchronous>, transform_indices = @transform_0, window_bounds = array<i64: 16, 16>}, {pipeline_mode = #tpu.pipeline_mode<synchronous>, transform_indices = @transform_1, window_bounds = array<i64: 128, 128>}, {transform_indices = @transform_2, window_bounds = array<i64: 1, 16, 128>}, {transform_indices = @transform_3, window_bounds = array<i64: 1, 16, 128>}]} {
    %c0 = arith.constant 0 : index
    %c0_0 = arith.constant 0 : index
    %0 = vector.load %arg1[%c0, %c0_0] : memref<16x16xbf16, #tpu.memory_space<vmem>>, vector<16x16xbf16>
    %c0_1 = arith.constant 0 : index
    %c0_2 = arith.constant 0 : index
    %c0_3 = arith.constant 0 : index
    %1 = vector.load %arg3[%c0_1, %c0_2, %c0_3] : memref<1x16x128xbf16, #tpu.memory_space<vmem>>, vector<1x16x128xbf16>
    %2 = vector.shape_cast %1 : vector<1x16x128xbf16> to vector<16x128xbf16>
    %cst = arith.constant dense<0.000000e+00> : vector<16x128xf32>
    %3 = tpu.matmul %0, %2, %cst {dimension_numbers = #tpu.dot_dimension_numbers<[1], [0], [0], [1], [0, 0, 1, 1], [], []>} : vector<16x16xbf16>, vector<16x128xbf16>, vector<16x128xf32> -> vector<16x128xf32>
    %4 = arith.truncf %3 : vector<16x128xf32> to vector<16x128xbf16>
    %c0_4 = arith.constant 0 : index
    %c0_5 = arith.constant 0 : index
    %5 = vector.load %arg2[%c0_4, %c0_5] : memref<128x128xbf16, #tpu.memory_space<vmem>>, vector<128x128xbf16>
    %cst_6 = arith.constant dense<0.000000e+00> : vector<16x128xf32>
    %6 = tpu.matmul %4, %5, %cst_6 {dimension_numbers = #tpu.dot_dimension_numbers<[1], [0], [0], [1], [0, 0, 1, 1], [], []>} : vector<16x128xbf16>, vector<128x128xbf16>, vector<16x128xf32> -> vector<16x128xf32>
    %c0_7 = arith.constant 0 : index
    %c0_8 = arith.constant 0 : index
    %c0_9 = arith.constant 0 : index
    %7 = vector.load %arg4[%c0_7, %c0_8, %c0_9] : memref<1x16x128xf32, #tpu.memory_space<vmem>>, vector<1x16x128xf32>
    %8 = vector.shape_cast %7 : vector<1x16x128xf32> to vector<16x128xf32>
    %9 = vector.shape_cast %6 : vector<16x128xf32> to vector<1x16x128xf32>
    tpu.vector_store %arg4[%c0_7, %c0_8, %c0_9], %9 {strides = array<i32>} : memref<1x16x128xf32, #tpu.memory_space<vmem>>, vector<1x16x128xf32>,
    return
  }
  func.func @transform_0(%arg0: i32) -> (i32, i32) {
    %c0_i32 = arith.constant 0 : i32
    %c0_i32_0 = arith.constant 0 : i32
    %c0_i32_1 = arith.constant 0 : i32
    return %c0_i32, %c0_i32_0 : i32, i32
  }
  func.func @transform_1(%arg0: i32) -> (i32, i32) {
    %c0_i32 = arith.constant 0 : i32
    %c0_i32_0 = arith.constant 0 : i32
    %c0_i32_1 = arith.constant 0 : i32
    return %c0_i32, %c0_i32_0 : i32, i32
  }
  func.func @transform_2(%arg0: i32) -> (i32, i32, i32) {
    %c0_i32 = arith.constant 0 : i32
    %c0_i32_0 = arith.constant 0 : i32
    %c0_i32_1 = arith.constant 0 : i32
    return %arg0, %c0_i32, %c0_i32_0 : i32, i32, i32
  }
  func.func @transform_3(%arg0: i32) -> (i32, i32, i32) {
    %c0_i32 = arith.constant 0 : i32
    %c0_i32_0 = arith.constant 0 : i32
    %c0_i32_1 = arith.constant 0 : i32
    return %arg0, %c0_i32, %c0_i32_0 : i32, i32, i32
  }
}

</mosaic_0001>

<bundles_post_ra>
// kernel: tpu_custom_call.1
= control target key start
LH: loop header
LB: loop body
LE: loop exit
PB: predicated region body
PF: predicated region fallthrough
CT: control target
= control target key end

     0   :  { %8 = vsyncpa [#allocation3], 0  ;;  %s499_s0 = inlined_call_operand.hbm [shape: bf16[16,16], index: 0, kind: input, shape index: {}]   ;;  %s500_s1 = inlined_call_operand.hbm [shape: bf16[128,128], index: 1, kind: input, shape index: {}]   ;;  %s501_s2 = inlined_call_operand.hbm [shape: bf16[1,16,128], index: 2, kind: input, shape index: {}]   ;;  %s502_s3 = inlined_call_operand.hbm [shape: f32[1,16,128], index: 3, kind: output, shape index: {}]  }
   0x1   :  { %9 = vsyncpa [#allocation6], 0 }
   0x2   :  { %10 = vsyncpa [#allocation4], 0  ;;  %s405_s12 = smov [#allocation5]   ;;  %s406_s14 = smov [#allocation2]  }
   0x3   :  { %s28_s13 = sshll.u32 %s405_s12, 4  ;;  %s16_s15 = sshll.u32 %s406_s14, 4  ;;  %s29_s13 = int_to_ptr.vmem [resolvable:$true] %s28_s13  ;;  %s435_s15 = int_to_ptr.vmem [resolvable:$true] %s16_s15 }
   0x4   :  { %s311_s18 = scalar_lea.hbm %s500_s1, 1024 }
   0x5   :  { %p312_p0 = scmp.ne.s32.totalorder %s500_s1, %s311_s18  ;;  %p315_p1 = scmp.lt.u32.totalorder %s311_s18, %s500_s1 }
   0x7   :  { %p317_p2 = pnand %p315_p1, %p312_p0 }
   0x9   :  { %320 = shalt.err (!%p317_p2)
}
   0xa   :  { %s321_s23 = scalar_lea.vmem %s29_s13, 1024  ;;  %p326_p4 = scmp.lt.s32.totalorder %s29_s13, %s29_s13 }
   0xb   :  { %p322_p3 = scmp.ne.s32.totalorder %s29_s13, %s321_s23  ;;  %p327_p5 = scmp.lt.s32.totalorder %s321_s23, %s321_s23 }
   0xd   :  { %p328_p6 = por %p327_p5, %p326_p4 }
   0xf   :  { %p329_p7 = pnand %p328_p6, %p322_p3 }
  0x11   :  { %332 = shalt.err (!%p329_p7)
}
  0x12   :  { %s407_s24 = smov 64   ;;  %s408_s25 = smov 4  }
  0x13   :  { %34 = dma.hbm_to_vmem [thread:$0]  %s500_s1, 1024, %s29_s13, [#allocation6], %s407_s24, %s407_s24, %s408_s25  }
  0x14   :  { %s333_s30 = scalar_lea.hbm %s499_s0, 128 }
  0x15   :  { %p334_p8 = scmp.ne.s32.totalorder %s499_s0, %s333_s30  ;;  %p337_p9 = scmp.lt.u32.totalorder %s333_s30, %s499_s0 }
  0x17   :  { %p339_p10 = pnand %p337_p9, %p334_p8 }
  0x19   :  { %342 = shalt.err (!%p339_p10)
}
  0x1a   :  { %s343_s8 = scalar_lea.vmem %s435_s15, 128  ;;  %p348_p12 = scmp.lt.s32.totalorder %s435_s15, %s435_s15 }
  0x1b   :  { %p344_p11 = scmp.ne.s32.totalorder %s435_s15, %s343_s8  ;;  %p349_p13 = scmp.lt.s32.totalorder %s343_s8, %s343_s8 }
  0x1d   :  { %p350_p0 = por %p349_p13, %p348_p12 }
  0x1f   :  { %p351_p1 = pnand %p350_p0, %p344_p11 }
  0x21   :  { %354 = shalt.err (!%p351_p1)
}
  0x22   :  { %22 = dma.hbm_to_vmem [thread:$0]  %s499_s0, 128, %s435_s15, [#allocation3], %s407_s24, %s407_s24, %s408_s25  }
  0x23   :  { %s409_s10 = smov [#allocation7]   ;;  %s355_s14 = scalar_lea.hbm %s501_s2, 128 }
  0x24   :  { %s40_s11 = sshll.u32 %s409_s10, 4  ;;  %p356_p2 = scmp.ne.s32.totalorder %s501_s2, %s355_s14  ;;  %s41_s11 = int_to_ptr.vmem [resolvable:$true] %s40_s11 }
  0x25   :  { %p359_p3 = scmp.lt.u32.totalorder %s355_s14, %s501_s2 }
  0x27   :  { %p361_p4 = pnand %p359_p3, %p356_p2 }
  0x29   :  { %364 = shalt.err (!%p361_p4)
}
  0x2a   :  { %s365_s20 = scalar_lea.vmem %s41_s11, 128  ;;  %p370_p6 = scmp.lt.s32.totalorder %s41_s11, %s41_s11 }
  0x2b   :  { %p366_p5 = scmp.ne.s32.totalorder %s41_s11, %s365_s20  ;;  %p371_p7 = scmp.lt.s32.totalorder %s365_s20, %s365_s20 }
  0x2d   :  { %p372_p8 = por %p371_p7, %p370_p6 }
  0x2f   :  { %p373_p9 = pnand %p372_p8, %p366_p5 }
  0x31   :  { %376 = shalt.err (!%p373_p9)
}
  0x32   :  { %46 = dma.hbm_to_vmem [thread:$0]  %s501_s2, 128, %s41_s11, [#allocation6], %s407_s24, %s407_s24, %s408_s25  }
  0x33   :  { %399 = dma.done.wait [#allocation3], 128  }
  0x34   :  { %400 = vsyncadd [#allocation3], 4294967168 }
  0x35   :  { %401 = dma.done.wait [#allocation6], 1152  }
  0x36   :  { %402 = vsyncadd [#allocation6], 4294966144  ;;  %v410_v0 = vmov 0.0   ;;  %vm411_vm0 = vmmov 0   ;;  %v301_v1 = vld [vmem:[#allocation7] sm:$0xff]   ;;  %v302_v2 = vld [vmem:[#allocation2] sm:$0xff]  }
  0x37   :  { %265 = vmatprep.subr.bf16.mxu0 %v410_v0  ;;  %267 = vmatprep.mubr.msk.bf16.mxu0 %vm411_vm0, %v410_v0  ;;  %vm72_vm1 = vcmask 130048   ;;  %v303_v3 = vld [vmem:[#allocation5] sm:$0xff]   ;;  %v304_v4 = vld [vmem:[#allocation5 + $0x8] sm:$0xff]   ;;  %v305_v5 = vld [vmem:[#allocation5 + $0x10] sm:$0xff]   ;;  %s412_s2 = smov [#allocation8]  }
  0x38   :  { %271 = vmatprep.subr.bf16.mxu1 %v410_v0  ;;  %287 = vmatprep.mubr.msk.bf16.mxu1 %vm411_vm0, %v410_v0  ;;  %v306_v6 = vld [vmem:[#allocation5 + $0x18] sm:$0xff]   ;;  %v307_v7 = vld [vmem:[#allocation5 + $0x20] sm:$0xff]   ;;  %v308_v8 = vld [vmem:[#allocation5 + $0x28] sm:$0xff]   ;;  %s230_s21 = sshll.u32 %s412_s2, 4  ;;  %s231_s21 = int_to_ptr.vmem [resolvable:$true] %s230_s21 }
  0x39   :  { %266 = vmatpush3.bf16.msra.mxu0 %v301_v1  ;;  %272 = vmatpush3.bf16.msra.mxu1 %v303_v3  ;;  %v309_v9 = vld [vmem:[#allocation5 + $0x30] sm:$0xff]   ;;  %v310_v10 = vld [vmem:[#allocation5 + $0x38] sm:$0xff]   ;;  %s377_s22 = scalar_lea.vmem %s231_s21, 256  ;;  %p382_p11 = scmp.lt.s32.totalorder %s231_s21, %s231_s21 }
  0x3a   :  { %273 = vmatprep.subr.bf16.mxu1 %v410_v0  ;;  %p378_p10 = scmp.ne.s32.totalorder %s231_s21, %s377_s22  ;;  %p383_p12 = scmp.lt.s32.totalorder %s377_s22, %s377_s22 }
  0x3c   :  { %268 = vmatmul.mubr.msk.bf16.vlgmr.msra.gmra.mrb[0].mxu0 %vm72_vm1, %v302_v2  ;;  %p384_p13 = por %p383_p12, %p382_p11 }
  0x3d   :  { %274 = vmatpush3.bf16.msra.mxu1 %v304_v4 }
  0x3e   :  { %275 = vmatprep.subr.bf16.mxu1 %v410_v0  ;;  %p385_p0 = pnand %p384_p13, %p378_p10 }
  0x41   :  { %276 = vmatpush3.bf16.msra.mxu1 %v305_v5 }
  0x42   :  { %277 = vmatprep.subr.bf16.mxu1 %v410_v0 }
  0x45   :  { %278 = vmatpush3.bf16.msra.mxu1 %v306_v6 }
  0x46   :  { %279 = vmatprep.subr.bf16.mxu1 %v410_v0 }
  0x49   :  { %280 = vmatpush3.bf16.msra.mxu1 %v307_v7 }
  0x4a   :  { %281 = vmatprep.subr.bf16.mxu1 %v410_v0 }
  0x4d   :  { %282 = vmatpush3.bf16.msra.mxu1 %v308_v8 }
  0x4e   :  { %283 = vmatprep.subr.bf16.mxu1 %v410_v0 }
  0x51   :  { %284 = vmatpush3.bf16.msra.mxu1 %v309_v9 }
  0x52   :  { %285 = vmatprep.subr.bf16.mxu1 %v410_v0 }
  0x55   :  { %286 = vmatpush3.bf16.msra.mxu1 %v310_v10 }
 0x10f   :  { %v110_v11 = vpop.f32.mrb[0].mxu0 }
 0x110   :  { %v269_v12 = vpop.f32.mrb[1].mxu0 }
 0x111   :  { %v113_v13 = vpop.f32.mrb[2].mxu0 }
 0x112   :  { %v117_v14 = vpack.c.bf16 %v113_v13, %v110_v11  ;;  %v270_v15 = vpop.f32.mrb[3].mxu0 }
 0x114   :  { %288 = vmatmul.mubr.bf16.vlgmr.msra.gmra.mrb[0].mxu1 %v117_v14 }
 0x1e7   :  { %v216_v16 = vpop.f32.mrb[0].mxu1 }
 0x1e8   :  { %223 = vst [vmem:[#allocation8] sm:$0xff] %v216_v16  ;;  %v289_v17 = vpop.f32.mrb[1].mxu1 }
 0x1e9   :  { %v219_v18 = vpop.f32.mrb[2].mxu1 }
 0x1ea   :  { %224 = vst [vmem:[#allocation8 + $0x8] sm:$0xff] %v219_v18  ;;  %v290_v19 = vpop.f32.mrb[3].mxu1 }
 0x1eb   :  { %388 = shalt.err (!%p385_p0)
}
 0x1ec   :  { %s389_s25 = scalar_lea.hbm %s502_s3, 256 }
 0x1ed   :  { %p390_p1 = scmp.ne.s32.totalorder %s502_s3, %s389_s25  ;;  %p393_p2 = scmp.lt.u32.totalorder %s389_s25, %s502_s3 }
 0x1ef   :  { %p395_p3 = pnand %p393_p2, %p390_p1 }
 0x1f1   :  { %398 = shalt.err (!%p395_p3)
}
 0x1f2   :  { %s413_s30 = smov 128   ;;  %s414_s4 = smov 8  }
 0x1f3   :  { %236 = dma.vmem_to_hbm [thread:$0]  %s231_s21, 256, %s502_s3, [#allocation4], %s413_s30, %s413_s30, %s414_s4  }
 0x1f4   :  { %403 = dma.done.wait [#allocation4], 256  }
 0x1f5   :  { %404 = vsyncadd [#allocation4], 4294967040 }
 0x1f6   :  { %240 = vsyncpa [#allocation3], 1 }
 0x1f7   :  { %241 = vsyncpa [#allocation6], 1 }
 0x1f8   :  { %242 = vsyncpa [#allocation4], 1 }

// kernel: tpu_custom_call.1
= control target key start
LH: loop header
LB: loop body
LE: loop exit
PB: predicated region body
PF: predicated region fallthrough
CT: control target
= control target key end

     0   :  { %8 = vsyncpa [#allocation3], 0  ;;  %s499_s0 = inlined_call_operand.hbm [shape: bf16[16,16], index: 0, kind: input, shape index: {}]   ;;  %s500_s1 = inlined_call_operand.hbm [shape: bf16[128,128], index: 1, kind: input, shape index: {}]   ;;  %s501_s2 = inlined_call_operand.hbm [shape: bf16[1,16,128], index: 2, kind: input, shape index: {}]   ;;  %s502_s3 = inlined_call_operand.hbm [shape: f32[1,16,128], index: 3, kind: output, shape index: {}]  }
   0x1   :  { %9 = vsyncpa [#allocation6], 0 }
   0x2   :  { %10 = vsyncpa [#allocation4], 0  ;;  %s405_s12 = smov [#allocation5]   ;;  %s406_s14 = smov [#allocation2]  }
   0x3   :  { %s28_s13 = sshll.u32 %s405_s12, 4  ;;  %s16_s15 = sshll.u32 %s406_s14, 4  ;;  %s29_s13 = int_to_ptr.vmem [resolvable:$true] %s28_s13  ;;  %s435_s15 = int_to_ptr.vmem [resolvable:$true] %s16_s15 }
   0x4   :  { %s311_s18 = scalar_lea.hbm %s500_s1, 1024 }
   0x5   :  { %p312_p0 = scmp.ne.s32.totalorder %s500_s1, %s311_s18  ;;  %p315_p1 = scmp.lt.u32.totalorder %s311_s18, %s500_s1 }
   0x7   :  { %p317_p2 = pnand %p315_p1, %p312_p0 }
   0x9   :  { %320 = shalt.err (!%p317_p2)
}
   0xa   :  { %s321_s23 = scalar_lea.vmem %s29_s13, 1024  ;;  %p326_p4 = scmp.lt.s32.totalorder %s29_s13, %s29_s13 }
   0xb   :  { %p322_p3 = scmp.ne.s32.totalorder %s29_s13, %s321_s23  ;;  %p327_p5 = scmp.lt.s32.totalorder %s321_s23, %s321_s23 }
   0xd   :  { %p328_p6 = por %p327_p5, %p326_p4 }
   0xf   :  { %p329_p7 = pnand %p328_p6, %p322_p3 }
  0x11   :  { %332 = shalt.err (!%p329_p7)
}
  0x12   :  { %s407_s24 = smov 64   ;;  %s408_s25 = smov 4  }
  0x13   :  { %34 = dma.hbm_to_vmem [thread:$0]  %s500_s1, 1024, %s29_s13, [#allocation6], %s407_s24, %s407_s24, %s408_s25  }
  0x14   :  { %s333_s30 = scalar_lea.hbm %s499_s0, 128 }
  0x15   :  { %p334_p8 = scmp.ne.s32.totalorder %s499_s0, %s333_s30  ;;  %p337_p9 = scmp.lt.u32.totalorder %s333_s30, %s499_s0 }
  0x17   :  { %p339_p10 = pnand %p337_p9, %p334_p8 }
  0x19   :  { %342 = shalt.err (!%p339_p10)
}
  0x1a   :  { %s343_s8 = scalar_lea.vmem %s435_s15, 128  ;;  %p348_p12 = scmp.lt.s32.totalorder %s435_s15, %s435_s15 }
  0x1b   :  { %p344_p11 = scmp.ne.s32.totalorder %s435_s15, %s343_s8  ;;  %p349_p13 = scmp.lt.s32.totalorder %s343_s8, %s343_s8 }
  0x1d   :  { %p350_p0 = por %p349_p13, %p348_p12 }
  0x1f   :  { %p351_p1 = pnand %p350_p0, %p344_p11 }
  0x21   :  { %354 = shalt.err (!%p351_p1)
}
  0x22   :  { %22 = dma.hbm_to_vmem [thread:$0]  %s499_s0, 128, %s435_s15, [#allocation3], %s407_s24, %s407_s24, %s408_s25  }
  0x23   :  { %s409_s10 = smov [#allocation7]   ;;  %s355_s14 = scalar_lea.hbm %s501_s2, 128 }
  0x24   :  { %s40_s11 = sshll.u32 %s409_s10, 4  ;;  %p356_p2 = scmp.ne.s32.totalorder %s501_s2, %s355_s14  ;;  %s41_s11 = int_to_ptr.vmem [resolvable:$true] %s40_s11 }
  0x25   :  { %p359_p3 = scmp.lt.u32.totalorder %s355_s14, %s501_s2 }
  0x27   :  { %p361_p4 = pnand %p359_p3, %p356_p2 }
  0x29   :  { %364 = shalt.err (!%p361_p4)
}
  0x2a   :  { %s365_s20 = scalar_lea.vmem %s41_s11, 128  ;;  %p370_p6 = scmp.lt.s32.totalorder %s41_s11, %s41_s11 }
  0x2b   :  { %p366_p5 = scmp.ne.s32.totalorder %s41_s11, %s365_s20  ;;  %p371_p7 = scmp.lt.s32.totalorder %s365_s20, %s365_s20 }
  0x2d   :  { %p372_p8 = por %p371_p7, %p370_p6 }
  0x2f   :  { %p373_p9 = pnand %p372_p8, %p366_p5 }
  0x31   :  { %376 = shalt.err (!%p373_p9)
}
  0x32   :  { %46 = dma.hbm_to_vmem [thread:$0]  %s501_s2, 128, %s41_s11, [#allocation6], %s407_s24, %s407_s24, %s408_s25  }
  0x33   :  { %399 = dma.done.wait [#allocation3], 128  }
  0x34   :  { %400 = vsyncadd [#allocation3], 4294967168 }
  0x35   :  { %401 = dma.done.wait [#allocation6], 1152  }
  0x36   :  { %402 = vsyncadd [#allocation6], 4294966144  ;;  %v410_v0 = vmov 0.0   ;;  %vm411_vm0 = vmmov 0   ;;  %v301_v1 = vld [vmem:[#allocation7] sm:$0xff]   ;;  %v302_v2 = vld [vmem:[#allocation2] sm:$0xff]  }
  0x37   :  { %265 = vmatprep.subr.bf16.mxu0 %v410_v0  ;;  %267 = vmatprep.mubr.msk.bf16.mxu0 %vm411_vm0, %v410_v0  ;;  %vm72_vm1 = vcmask 130048   ;;  %v303_v3 = vld [vmem:[#allocation5] sm:$0xff]   ;;  %v304_v4 = vld [vmem:[#allocation5 + $0x8] sm:$0xff]   ;;  %v305_v5 = vld [vmem:[#allocation5 + $0x10] sm:$0xff]   ;;  %s412_s2 = smov [#allocation8]  }
  0x38   :  { %271 = vmatprep.subr.bf16.mxu1 %v410_v0  ;;  %287 = vmatprep.mubr.msk.bf16.mxu1 %vm411_vm0, %v410_v0  ;;  %v306_v6 = vld [vmem:[#allocation5 + $0x18] sm:$0xff]   ;;  %v307_v7 = vld [vmem:[#allocation5 + $0x20] sm:$0xff]   ;;  %v308_v8 = vld [vmem:[#allocation5 + $0x28] sm:$0xff]   ;;  %s230_s21 = sshll.u32 %s412_s2, 4  ;;  %s231_s21 = int_to_ptr.vmem [resolvable:$true] %s230_s21 }
  0x39   :  { %266 = vmatpush3.bf16.msra.mxu0 %v301_v1  ;;  %272 = vmatpush3.bf16.msra.mxu1 %v303_v3  ;;  %v309_v9 = vld [vmem:[#allocation5 + $0x30] sm:$0xff]   ;;  %v310_v10 = vld [vmem:[#allocation5 + $0x38] sm:$0xff]   ;;  %s377_s22 = scalar_lea.vmem %s231_s21, 256  ;;  %p382_p11 = scmp.lt.s32.totalorder %s231_s21, %s231_s21 }
  0x3a   :  { %273 = vmatprep.subr.bf16.mxu1 %v410_v0  ;;  %p378_p10 = scmp.ne.s32.totalorder %s231_s21, %s377_s22  ;;  %p383_p12 = scmp.lt.s32.totalorder %s377_s22, %s377_s22 }
  0x3c   :  { %268 = vmatmul.mubr.msk.bf16.vlgmr.msra.gmra.mrb[0].mxu0 %vm72_vm1, %v302_v2  ;;  %p384_p13 = por %p383_p12, %p382_p11 }
  0x3d   :  { %274 = vmatpush3.bf16.msra.mxu1 %v304_v4 }
  0x3e   :  { %275 = vmatprep.subr.bf16.mxu1 %v410_v0  ;;  %p385_p0 = pnand %p384_p13, %p378_p10 }
  0x41   :  { %276 = vmatpush3.bf16.msra.mxu1 %v305_v5 }
  0x42   :  { %277 = vmatprep.subr.bf16.mxu1 %v410_v0 }
  0x45   :  { %278 = vmatpush3.bf16.msra.mxu1 %v306_v6 }
  0x46   :  { %279 = vmatprep.subr.bf16.mxu1 %v410_v0 }
  0x49   :  { %280 = vmatpush3.bf16.msra.mxu1 %v307_v7 }
  0x4a   :  { %281 = vmatprep.subr.bf16.mxu1 %v410_v0 }
  0x4d   :  { %282 = vmatpush3.bf16.msra.mxu1 %v308_v8 }
  0x4e   :  { %283 = vmatprep.subr.bf16.mxu1 %v410_v0 }
  0x51   :  { %284 = vmatpush3.bf16.msra.mxu1 %v309_v9 }
  0x52   :  { %285 = vmatprep.subr.bf16.mxu1 %v410_v0 }
  0x55   :  { %286 = vmatpush3.bf16.msra.mxu1 %v310_v10 }
 0x10f   :  { %v110_v11 = vpop.f32.mrb[0].mxu0 }
 0x110   :  { %v269_v12 = vpop.f32.mrb[1].mxu0 }
 0x111   :  { %v113_v13 = vpop.f32.mrb[2].mxu0 }
 0x112   :  { %v117_v14 = vpack.c.bf16 %v113_v13, %v110_v11  ;;  %v270_v15 = vpop.f32.mrb[3].mxu0 }
 0x114   :  { %288 = vmatmul.mubr.bf16.vlgmr.msra.gmra.mrb[0].mxu1 %v117_v14 }
 0x1e7   :  { %v216_v16 = vpop.f32.mrb[0].mxu1 }
 0x1e8   :  { %223 = vst [vmem:[#allocation8] sm:$0xff] %v216_v16  ;;  %v289_v17 = vpop.f32.mrb[1].mxu1 }
 0x1e9   :  { %v219_v18 = vpop.f32.mrb[2].mxu1 }
 0x1ea   :  { %224 = vst [vmem:[#allocation8 + $0x8] sm:$0xff] %v219_v18  ;;  %v290_v19 = vpop.f32.mrb[3].mxu1 }
 0x1eb   :  { %388 = shalt.err (!%p385_p0)
}
 0x1ec   :  { %s389_s25 = scalar_lea.hbm %s502_s3, 256 }
 0x1ed   :  { %p390_p1 = scmp.ne.s32.totalorder %s502_s3, %s389_s25  ;;  %p393_p2 = scmp.lt.u32.totalorder %s389_s25, %s502_s3 }
 0x1ef   :  { %p395_p3 = pnand %p393_p2, %p390_p1 }
 0x1f1   :  { %398 = shalt.err (!%p395_p3)
}
 0x1f2   :  { %s413_s30 = smov 128   ;;  %s414_s4 = smov 8  }
 0x1f3   :  { %236 = dma.vmem_to_hbm [thread:$0]  %s231_s21, 256, %s502_s3, [#allocation4], %s413_s30, %s413_s30, %s414_s4  }
 0x1f4   :  { %403 = dma.done.wait [#allocation4], 256  }
 0x1f5   :  { %404 = vsyncadd [#allocation4], 4294967040 }
 0x1f6   :  { %240 = vsyncpa [#allocation3], 1 }
 0x1f7   :  { %241 = vsyncpa [#allocation6], 1 }
 0x1f8   :  { %242 = vsyncpa [#allocation4], 1 }

</bundles_post_ra>
